<compile_context>
chip_gen: v5e
topology: v5e:2x2
jax: 0.10.0
libtpu: 0.0.40
codegen_flags: <defaults>
</compile_context>

<pallas_src>
import jax
import jax.numpy as jnp
from jax.experimental import pallas as pl
from jax.experimental.pallas import tpu as pltpu


def _pol_net_forward_kernel(xT_ref, w_ref, b_ref, o_ref):
    # xT_ref: (F, tb) VMEM (f32 or bf16) -- batch on the lane (fast) axis
    # w_ref : (F,)    SMEM f32           -- the single Linear weight row
    # b_ref : (1,)    SMEM f32           -- bias
    # o_ref : (1, tb) VMEM f32           -- lane-dense output tile
    f_dim = xT_ref.shape[0]
    acc = jnp.zeros(o_ref.shape, dtype=jnp.float32) + b_ref[0]
    # F = 6: unrolled VPU multiply-adds over the sublane axis; scalar weights
    # come from SMEM, so there is no cross-lane reduce and no MXU involvement.
    for f in range(f_dim):
        row = xT_ref[pl.ds(f, 1), :].astype(jnp.float32)
        acc = acc + w_ref[f] * row
    o_ref[...] = acc


def _round_up(n, m):
    return ((n + m - 1) // m) * m


def pol_net_forward(x, weight, bias, *, block_b=65536, min_pallas_batch=4096,
                    force_pallas=False, x_is_transposed=False):
    """Forward of pol_net: y = x @ weight.T + bias.

    x: (B, 2*window) [or (2*window, B) if x_is_transposed] f32/bf16,
    weight: (1, 2*window) f32, bias: (1,) f32  ->  (B, 1) f32.
    """
    x = jnp.asarray(x)
    if x.dtype != jnp.bfloat16:
        x = x.astype(jnp.float32)   # keep bf16 as-is (halves HBM read traffic)

    if x_is_transposed:
        F, B = x.shape
        xT = x
    else:
        B, F = x.shape
        xT = None  # transpose only if we actually take the Pallas path

    w = jnp.asarray(weight, jnp.float32).reshape(F)
    b = jnp.asarray(bias, jnp.float32).reshape(1)

    # Small-batch fallback: Pallas launch + layout plumbing costs orders of
    # magnitude more than the ~12*B FLOPs of work for tiny B.
    if B < min_pallas_batch and not force_pallas:
        x2d = x if not x_is_transposed else x.T
        return x2d.astype(jnp.float32) @ w[:, None] + b[None, :]

    if xT is None:
        xT = x.T                                        # (F, B): batch on lanes

    # Lane tile: large enough to amortize per-step overhead, but (a) within the
    # default scoped-VMEM budget on all generations (double-buffered, sublane-
    # padded working set ~= 128*tb bytes -> 8 MiB at tb=64K) and (b) capped at
    # ceil(B/4) lanes so large batches keep >=4 grid steps for v7x's two TCs.
    tb = min(_round_up(block_b, 128), _round_up(-(-B // 4), 128))
    tb = max(tb, 128)

    out = pl.pallas_call(
        _pol_net_forward_kernel,
        out_shape=jax.ShapeDtypeStruct((1, B), jnp.float32),
        grid=(pl.cdiv(B, tb),),                         # ragged tail, no pad
        in_specs=[
            pl.BlockSpec((F, tb), lambda i: (0, i)),    # xT, tiled over batch
            pl.BlockSpec(memory_space=pltpu.SMEM),      # weight row (F,)
            pl.BlockSpec(memory_space=pltpu.SMEM),      # bias (1,)
        ],
        out_specs=pl.BlockSpec((1, tb), lambda i: (0, i)),
        compiler_params=pltpu.CompilerParams(
            dimension_semantics=("parallel",)),
    )(xT, w, b)

    return out.T                                        # (B, 1)


if __name__ == "__main__":
    key = jax.random.PRNGKey(0)
    kb, kx, kx2, kx3 = jax.random.split(key, 4)

    # Module hyperparameters (from pol_net.__init__)
    window = 3
    in_features = 2 * window          # Linear(2*window, 1)
    num_classes = 4                   # stands in for len(self.net.classes)
    HARDCODED_INIT = -5.0
    B = 2                             # small batch of states

    # Deterministic parameter init, matching the module's weight fill rule:
    #   linear.weight.data.fill_(len(net.classes) * HARDCODED_INIT / (2*window))
    w_fill = num_classes * HARDCODED_INIT / in_features
    weight = jnp.full((1, in_features), w_fill, dtype=jnp.float32)
    # Bias: deterministic draw in PyTorch's default Linear-bias range.
    bound = 1.0 / (in_features ** 0.5)
    bias = jax.random.uniform(kb, (1,), minval=-bound, maxval=bound,
                              dtype=jnp.float32)

    # --- 1) Tiny batch, Pallas path forced on (single ragged block). ---
    x = jax.random.normal(kx, (B, in_features), dtype=jnp.float32)
    out = jax.block_until_ready(pol_net_forward(x, weight, bias,
                                                force_pallas=True))
    ref = x @ weight.T + bias[None, :]
    assert out.shape == (B, 1)
    assert jnp.allclose(out, ref, atol=1e-5), (out, ref)

    # --- 2) Multi-step grid with a ragged tail (no wrapper pad). ---
    B2 = 300
    x2 = jax.random.normal(kx2, (B2, in_features), dtype=jnp.float32)
    out2 = jax.block_until_ready(
        pol_net_forward(x2, weight, bias, block_b=128, force_pallas=True))
    ref2 = x2 @ weight.T + bias[None, :]
    assert out2.shape == (B2, 1)
    assert jnp.allclose(out2, ref2, atol=1e-5)

    # --- 3) bf16 activations: DMA'd as bf16, cast to f32 in-kernel. ---
    x3 = jax.random.normal(kx3, (B2, in_features), dtype=jnp.float32)
    x3_bf16 = x3.astype(jnp.bfloat16)
    out3 = jax.block_until_ready(
        pol_net_forward(x3_bf16, weight, bias, block_b=128, force_pallas=True))
    ref3 = x3_bf16.astype(jnp.float32) @ weight.T + bias[None, :]
    assert jnp.allclose(out3, ref3, atol=1e-4)

    # --- 4) Small-batch fallback path (plain XLA dot). ---
    out4 = jax.block_until_ready(pol_net_forward(x, weight, bias))
    assert jnp.allclose(out4, ref, atol=1e-5)

    # TODO(synk): select_action / sample_trajectories / update_pol / train are
    # RL training-loop + autograd logic (Normal sampling, Adam), not a forward
    # hot path, so they are intentionally not kernelized.
    print("KERNEL_OK")
</pallas_src>

<mosaic_0001>
module attributes {stable_mosaic.version = 11 : i64} {
  func.func @_pol_net_forward_kernel(%arg0: i32, %arg1: memref<6x128xf32, #tpu.memory_space<vmem>>, %arg2: memref<6xf32, #tpu.memory_space<smem>>, %arg3: memref<1xf32, #tpu.memory_space<smem>>, %arg4: memref<1x128xf32, #tpu.memory_space<vmem>>) attributes {dimension_semantics = [#tpu.dimension_semantics<parallel>], iteration_bounds = array<i64: 1>, scalar_prefetch = 0 : i64, scratch_operands = 0 : i64, tpu.core_type = #tpu.core_type<tc>, window_params = [{transform_indices = @transform_0, window_bounds = array<i64: 6, 128>}, {transform_indices = @transform_1, window_bounds = array<i64: 6>}, {transform_indices = @transform_2, window_bounds = array<i64: 1>}, {transform_indices = @transform_3, window_bounds = array<i64: 1, 128>}]} {
    %cst = arith.constant 0.000000e+00 : f32
    %0 = vector.broadcast %cst : f32 to vector<1x128xf32>
    %c0 = arith.constant 0 : index
    %1 = memref.load %arg3[%c0] : memref<1xf32, #tpu.memory_space<smem>>
    %2 = vector.broadcast %1 : f32 to vector<1x128xf32>
    %3 = arith.addf %0, %2 : vector<1x128xf32>
    %c0_0 = arith.constant 0 : index
    %c0_1 = arith.constant 0 : index
    %4 = vector.load %arg1[%c0_0, %c0_1] : memref<6x128xf32, #tpu.memory_space<vmem>>, vector<1x128xf32>
    %c0_2 = arith.constant 0 : index
    %5 = memref.load %arg2[%c0_2] : memref<6xf32, #tpu.memory_space<smem>>
    %6 = vector.broadcast %5 : f32 to vector<1x128xf32>
    %7 = arith.mulf %6, %4 : vector<1x128xf32>
    %8 = arith.addf %3, %7 : vector<1x128xf32>
    %c1 = arith.constant 1 : index
    %c0_3 = arith.constant 0 : index
    %9 = vector.load %arg1[%c1, %c0_3] : memref<6x128xf32, #tpu.memory_space<vmem>>, vector<1x128xf32>
    %c1_4 = arith.constant 1 : index
    %10 = memref.load %arg2[%c1_4] : memref<6xf32, #tpu.memory_space<smem>>
    %11 = vector.broadcast %10 : f32 to vector<1x128xf32>
    %12 = arith.mulf %11, %9 : vector<1x128xf32>
    %13 = arith.addf %8, %12 : vector<1x128xf32>
    %c2 = arith.constant 2 : index
    %c0_5 = arith.constant 0 : index
    %14 = vector.load %arg1[%c2, %c0_5] : memref<6x128xf32, #tpu.memory_space<vmem>>, vector<1x128xf32>
    %c2_6 = arith.constant 2 : index
    %15 = memref.load %arg2[%c2_6] : memref<6xf32, #tpu.memory_space<smem>>
    %16 = vector.broadcast %15 : f32 to vector<1x128xf32>
    %17 = arith.mulf %16, %14 : vector<1x128xf32>
    %18 = arith.addf %13, %17 : vector<1x128xf32>
    %c3 = arith.constant 3 : index
    %c0_7 = arith.constant 0 : index
    %19 = vector.load %arg1[%c3, %c0_7] : memref<6x128xf32, #tpu.memory_space<vmem>>, vector<1x128xf32>
    %c3_8 = arith.constant 3 : index
    %20 = memref.load %arg2[%c3_8] : memref<6xf32, #tpu.memory_space<smem>>
    %21 = vector.broadcast %20 : f32 to vector<1x128xf32>
    %22 = arith.mulf %21, %19 : vector<1x128xf32>
    %23 = arith.addf %18, %22 : vector<1x128xf32>
    %c4 = arith.constant 4 : index
    %c0_9 = arith.constant 0 : index
    %24 = vector.load %arg1[%c4, %c0_9] : memref<6x128xf32, #tpu.memory_space<vmem>>, vector<1x128xf32>
    %c4_10 = arith.constant 4 : index
    %25 = memref.load %arg2[%c4_10] : memref<6xf32, #tpu.memory_space<smem>>
    %26 = vector.broadcast %25 : f32 to vector<1x128xf32>
    %27 = arith.mulf %26, %24 : vector<1x128xf32>
    %28 = arith.addf %23, %27 : vector<1x128xf32>
    %c5 = arith.constant 5 : index
    %c0_11 = arith.constant 0 : index
    %29 = vector.load %arg1[%c5, %c0_11] : memref<6x128xf32, #tpu.memory_space<vmem>>, vector<1x128xf32>
    %c5_12 = arith.constant 5 : index
    %30 = memref.load %arg2[%c5_12] : memref<6xf32, #tpu.memory_space<smem>>
    %31 = vector.broadcast %30 : f32 to vector<1x128xf32>
    %32 = arith.mulf %31, %29 : vector<1x128xf32>
    %33 = arith.addf %28, %32 : vector<1x128xf32>
    %c0_13 = arith.constant 0 : index
    %c0_14 = arith.constant 0 : index
    %34 = vector.load %arg4[%c0_13, %c0_14] : memref<1x128xf32, #tpu.memory_space<vmem>>, vector<1x128xf32>
    tpu.vector_store %arg4[%c0_13, %c0_14], %33 {strides = array<i32>} : memref<1x128xf32, #tpu.memory_space<vmem>>, vector<1x128xf32>,
    return
  }
  func.func @transform_0(%arg0: i32) -> (i32, i32) {
    %c0_i32 = arith.constant 0 : i32
    %c0_i32_0 = arith.constant 0 : i32
    return %c0_i32, %arg0 : i32, i32
  }
  func.func @transform_1(%arg0: i32) -> i32 {
    %c0_i32 = arith.constant 0 : i32
    %c0_i32_0 = arith.constant 0 : i32
    return %c0_i32 : i32
  }
  func.func @transform_2(%arg0: i32) -> i32 {
    %c0_i32 = arith.constant 0 : i32
    %c0_i32_0 = arith.constant 0 : i32
    return %c0_i32 : i32
  }
  func.func @transform_3(%arg0: i32) -> (i32, i32) {
    %c0_i32 = arith.constant 0 : i32
    %c0_i32_0 = arith.constant 0 : i32
    return %c0_i32, %arg0 : i32, i32
  }
}

</mosaic_0001>

<bundles_post_ra>
// kernel: tpu_custom_call.1
= control target key start
LH: loop header
LB: loop body
LE: loop exit
PB: predicated region body
PF: predicated region fallthrough
CT: control target
= control target key end

     0   :  { %9 = vsyncpa [#allocation5], 0  ;;  %s176_s0 = inlined_call_operand.vmem [shape: f32[6,2], index: 0, kind: input, shape index: {}]   ;;  %s177_s1 = inlined_call_operand.vmem [shape: f32[6], index: 1, kind: input, shape index: {}]   ;;  %s178_s2 = inlined_call_operand.<no memory space> [shape: f32[1], index: 2, kind: input, shape index: {}]   ;;  %s179_s3 = inlined_call_operand.hbm [shape: f32[1,2], index: 3, kind: output, shape index: {}]  }
   0x1   :  { %10 = vsyncpa [#allocation4], 0  ;;  %s18_s14 = sshll.u32 %s177_s1, 4  ;;  %s127_s15 = smov [#allocation3]   ;;  %s19_s14 = int_to_ptr.vmem [resolvable:$true] %s18_s14 }
   0x2   :  { %21 = dma.vmem_to_smem %s19_s14, 16, %s127_s15, [#allocation5]  }
   0x3   :  { %123 = dma.done.wait [#allocation5], 16  }
   0x4   :  { %124 = vsyncadd [#allocation5], 4294967280 }
   0x5   :  { %28 = sfence }
   0x6   :  { %s33_s16 = sld [smem:[#allocation3]]  ;;  %v32_v0 = vld [vmem:[%s176_s0] sm:$0x1]  ;;  %v37_v1 = vld [vmem:[%s176_s0 + $0x1] sm:$0x1]  ;;  %v30_v2 = vstv %s178_s2  ;;  %s128_s7 = smov [#allocation6]  }
   0x7   :  { %s80_s17 = sld [smem:[#allocation3 + $0x1]]  ;;  %v42_v4 = vld [vmem:[%s176_s0 + $0x2] sm:$0x1]  ;;  %v47_v9 = vld [vmem:[%s176_s0 + $0x3] sm:$0x1]  ;;  %s68_s8 = sshll.u32 %s128_s7, 4  ;;  %s69_s8 = int_to_ptr.vmem [resolvable:$true] %s68_s8 }
   0x8   :  { %s81_s18 = sld [smem:[#allocation3 + $0x2]]  ;;  %v52_v13 = vld [vmem:[%s176_s0 + $0x4] sm:$0x1]  ;;  %v57_v17 = vld [vmem:[%s176_s0 + $0x5] sm:$0x1]  ;;  %s70_s11 = sshll.u32 %s179_s3, 4  ;;  %s71_s11 = int_to_ptr.hbm [resolvable:$true] %s70_s11 }
   0x9   :  { %s82_s19 = sld [smem:[#allocation3 + $0x3]] }
   0xa   :  { %s83_s22 = sld [smem:[#allocation3 + $0x4]] }
   0xb   :  { %s84_s1 = sld [smem:[#allocation3 + $0x5]] }
   0xc   :  { %v34_v3 = vstv %s33_s16 }
   0xd   :  { %v35_v5 = vmul.f32 %v34_v3, %v32_v0  ;;  %v39_v6 = vstv %s80_s17 }
   0xe   :  { %v40_v7 = vmul.f32 %v39_v6, %v37_v1  ;;  %v44_v8 = vstv %s81_s18 }
   0xf   :  { %v36_v10 = vadd.f32 %v35_v5, %v30_v2  ;;  %v45_v11 = vmul.f32 %v44_v8, %v42_v4  ;;  %v49_v12 = vstv %s82_s19 }
  0x10   :  { %v54_v14 = vstv %s83_s22  ;;  %v50_v16 = vmul.f32 %v49_v12, %v47_v9 }
  0x11   :  { %v41_v15 = vadd.f32 %v40_v7, %v36_v10  ;;  %v59_v18 = vstv %s84_s1  ;;  %v55_v20 = vmul.f32 %v54_v14, %v52_v13 }
  0x12   :  { %v60_v22 = vmul.f32 %v59_v18, %v57_v17 }
  0x13   :  { %v46_v19 = vadd.f32 %v45_v11, %v41_v15 }
  0x15   :  { %v51_v21 = vadd.f32 %v50_v16, %v46_v19 }
  0x17   :  { %v56_v23 = vadd.f32 %v55_v20, %v51_v21 }
  0x19   :  { %v61_v24 = vadd.f32 %v60_v22, %v56_v23 }
  0x1b   :  { %62 = vst [vmem:[#allocation6] sm:$0x1] %v61_v24 }
  0x1c   :  { %73 = dma.vmem_to_hbm [thread:$0]  %s69_s8, 16, %s71_s11, [#allocation4]  }
  0x1d   :  { %125 = dma.done.wait [#allocation4], 16  }
  0x1e   :  { %126 = vsyncadd [#allocation4], 4294967280 }
  0x1f   :  { %78 = vsyncpa [#allocation4], 1 }
  0x20   :  { %79 = vsyncpa [#allocation5], 1 }

</bundles_post_ra>
